<compile_context>
chip_gen: v6e
topology: v6e:2x2x1
jax: 0.10.0
libtpu: 0.0.40
codegen_flags: <defaults>
</compile_context>

<pallas_src>
import functools

import jax
import jax.numpy as jnp
from jax.experimental import pallas as pl
from jax.experimental.pallas import tpu as pltpu


def _contrastive_loss_kernel(o1_ref, o2_ref, out_ref, acc_ref, *,
                             margin, eps, target, tb, nt, batch):
    # o1_ref, o2_ref: (TB, D_pad) native-dtype VMEM tiles.
    # out_ref: (1, 1) f32 partial sum for this core chunk.
    # acc_ref: (1, 1) f32 VMEM scratch accumulator (resident across the
    #          "arbitrary" tile axis).
    c = pl.program_id(0)          # core-chunk (parallel) axis
    t = pl.program_id(1)          # tile (reduction) axis

    @pl.when(t == 0)
    def _():
        acc_ref[...] = jnp.zeros_like(acc_ref)

    # Upcast in-kernel; stream native dtype from HBM.
    x1 = o1_ref[...].astype(jnp.float32)
    x2 = o2_ref[...].astype(jnp.float32)
    diff = x2 - x1                                            # (TB, D_pad)
    distances = jnp.sum(diff * diff, axis=1, keepdims=True)   # (TB, 1)

    # Static specialization on `target` (Python float at trace time).
    if target == 1.0:
        losses = 0.5 * distances
    elif target == 0.0:
        hinge = jnp.maximum(margin - jnp.sqrt(distances + eps), 0.0)
        losses = 0.5 * hinge * hinge
    else:
        hinge = jnp.maximum(margin - jnp.sqrt(distances + eps), 0.0)
        losses = 0.5 * (target * distances + (1.0 - target) * hinge * hinge)

    # Mask rows past the true batch size (last partial tile / batch padding).
    row = jax.lax.broadcasted_iota(jnp.int32, (tb, 1), 0)
    global_row = (c * nt + t) * tb + row
    losses = jnp.where(global_row < batch, losses, 0.0)

    acc_ref[...] += jnp.sum(losses, keepdims=True)            # (1, 1)

    @pl.when(t == pl.num_programs(1) - 1)
    def _():
        out_ref[...] = acc_ref[...]


def contrastive_loss(output1, output2, target=1, size_average=True,
                     margin=0.1, eps=1e-9):
    """Pallas implementation of ContrastiveLoss.forward. Returns a scalar."""
    assert output1.shape == output2.shape and output1.ndim == 2
    B, D = output1.shape
    itemsize = jnp.dtype(output1.dtype).itemsize

    # Lane-dense feature dim (multiple of 128); zero-pad is exact (diff == 0).
    D_pad = pl.cdiv(D, 128) * 128

    # Batch tile: multiple of 8 sublanes, capped so one input block stays
    # ~<= 2 MiB (2 inputs x 2 pipeline buffers fits comfortably in v7x VMEM).
    tb_cap = max(8, ((2 * 1024 * 1024) // (D_pad * itemsize)) // 8 * 8)
    TB = int(min(512, tb_cap, pl.cdiv(B, 8) * 8))

    total_tiles = pl.cdiv(B, TB)
    NC = 2 if total_tiles >= 2 else 1      # core-chunk split (v7x megacore)
    NT = pl.cdiv(total_tiles, NC)          # tiles per core chunk
    B_pad = NC * NT * TB

    # Zero-pad (native dtype) only when needed; padded rows are masked in-kernel.
    if B_pad != B or D_pad != D:
        o1 = jnp.pad(output1, ((0, B_pad - B), (0, D_pad - D)))
        o2 = jnp.pad(output2, ((0, B_pad - B), (0, D_pad - D)))
    else:
        o1, o2 = output1, output2

    kernel = functools.partial(
        _contrastive_loss_kernel,
        margin=float(margin),
        eps=float(eps),
        target=float(target),
        tb=TB,
        nt=NT,
        batch=B,
    )

    in_map = lambda c, t: (c * NT + t, 0)
    partial = pl.pallas_call(
        kernel,
        out_shape=jax.ShapeDtypeStruct((NC, 1), jnp.float32),
        grid_spec=pltpu.PrefetchScalarGridSpec(
            num_scalar_prefetch=0,
            grid=(NC, NT),
            in_specs=[
                pl.BlockSpec((TB, D_pad), in_map),
                pl.BlockSpec((TB, D_pad), in_map),
            ],
            out_specs=pl.BlockSpec((1, 1), lambda c, t: (c, 0)),
            scratch_shapes=[pltpu.VMEM((1, 1), jnp.float32)],
        ),
        compiler_params=pltpu.CompilerParams(
            dimension_semantics=("parallel", "arbitrary")),
    )(o1, o2)

    total = jnp.sum(partial)
    if size_average:
        total = total / jnp.float32(B)     # single divide, once, in the wrapper
    return total


def _contrastive_loss_ref(output1, output2, target=1, size_average=True,
                          margin=0.1, eps=1e-9):
    o1 = output1.astype(jnp.float32)
    o2 = output2.astype(jnp.float32)
    distances = jnp.sum((o2 - o1) ** 2, axis=1)
    losses = 0.5 * (target * distances +
                    (1 + -1 * target) *
                    jnp.maximum(margin - jnp.sqrt(distances + eps), 0.0) ** 2)
    return jnp.mean(losses) if size_average else jnp.sum(losses)


if __name__ == "__main__":
    key = jax.random.PRNGKey(0)
    k1, k2, k3, k4 = jax.random.split(key, 4)

    # Small shape consistent with the module (embedding pairs).
    B, D = 8, 32
    output1 = jax.random.normal(k1, (B, D), dtype=jnp.float32)
    output2 = jax.random.normal(k2, (B, D), dtype=jnp.float32)

    # Default call path: target=1, size_average=True, margin=0.1 (as in __init__).
    loss = contrastive_loss(output1, output2, target=1, size_average=True,
                            margin=0.1)
    jax.block_until_ready(loss)
    ref = _contrastive_loss_ref(output1, output2, target=1, size_average=True,
                                margin=0.1)
    assert jnp.allclose(loss, ref, rtol=1e-5, atol=1e-6), (loss, ref)

    # target=0 / sum branch (exercises the hinge path).
    loss0 = contrastive_loss(output1, output2, target=0, size_average=False,
                             margin=0.1)
    jax.block_until_ready(loss0)
    ref0 = _contrastive_loss_ref(output1, output2, target=0, size_average=False,
                                 margin=0.1)
    assert jnp.allclose(loss0, ref0, rtol=1e-5, atol=1e-6), (loss0, ref0)

    # Ragged shape + bf16 inputs: exercises D/B padding, row masking and the
    # in-kernel upcast path.
    Br, Dr = 10, 48
    b1 = jax.random.normal(k3, (Br, Dr), dtype=jnp.bfloat16)
    b2 = jax.random.normal(k4, (Br, Dr), dtype=jnp.bfloat16)
    loss_r = contrastive_loss(b1, b2, target=1, size_average=True, margin=0.1)
    jax.block_until_ready(loss_r)
    ref_r = _contrastive_loss_ref(b1, b2, target=1, size_average=True,
                                  margin=0.1)
    assert jnp.allclose(loss_r, ref_r, rtol=1e-2, atol=1e-3), (loss_r, ref_r)

    print("KERNEL_OK")
</pallas_src>

<mosaic_0001>
module attributes {stable_mosaic.version = 11 : i64} {
  func.func @_contrastive_loss_kernel(%arg0: i32, %arg1: i32, %arg2: memref<8x128xf32, #tpu.memory_space<vmem>>, %arg3: memref<8x128xf32, #tpu.memory_space<vmem>>, %arg4: memref<1x1xf32, #tpu.memory_space<vmem>>, %arg5: memref<1x1xf32, #tpu.memory_space<vmem>>) attributes {dimension_semantics = [#tpu.dimension_semantics<parallel>, #tpu.dimension_semantics<arbitrary>], iteration_bounds = array<i64: 1, 1>, scalar_prefetch = 0 : i64, scratch_operands = 1 : i64, tpu.core_type = #tpu.core_type<tc>, window_params = [{transform_indices = @transform_0, window_bounds = array<i64: 8, 128>}, {transform_indices = @transform_1, window_bounds = array<i64: 8, 128>}, {transform_indices = @transform_2, window_bounds = array<i64: 1, 1>}]} {
    %c0_i32 = arith.constant 0 : i32
    %0 = arith.cmpi eq, %arg1, %c0_i32 : i32
    %1 = arith.extui %0 : i1 to i32
    %c0_i32_0 = arith.constant 0 : i32
    %2 = arith.cmpi ne, %1, %c0_i32_0 : i32
    scf.if %2 {
      %cst_14 = arith.constant 0.000000e+00 : f32
      %32 = vector.broadcast %cst_14 : f32 to vector<1x1xf32>
      %c0_15 = arith.constant 0 : index
      %c0_16 = arith.constant 0 : index
      %33 = vector.load %arg5[%c0_15, %c0_16] : memref<1x1xf32, #tpu.memory_space<vmem>>, vector<1x1xf32>
      tpu.vector_store %arg5[%c0_15, %c0_16], %32 {strides = array<i32>} : memref<1x1xf32, #tpu.memory_space<vmem>>, vector<1x1xf32>,
    } else {
    }
    %c0 = arith.constant 0 : index
    %c0_1 = arith.constant 0 : index
    %3 = vector.load %arg2[%c0, %c0_1] : memref<8x128xf32, #tpu.memory_space<vmem>>, vector<8x128xf32>
    %c0_2 = arith.constant 0 : index
    %c0_3 = arith.constant 0 : index
    %4 = vector.load %arg3[%c0_2, %c0_3] : memref<8x128xf32, #tpu.memory_space<vmem>>, vector<8x128xf32>
    %5 = arith.subf %4, %3 : vector<8x128xf32>
    %6 = arith.mulf %5, %5 : vector<8x128xf32>
    %cst = arith.constant dense<0.000000e+00> : vector<8xf32>
    %7 = vector.multi_reduction <add>, %6, %cst [1] : vector<8x128xf32> to vector<8xf32>
    %8 = vector.shape_cast %7 : vector<8xf32> to vector<8x1xf32>
    %cst_4 = arith.constant 5.000000e-01 : f32
    %9 = vector.broadcast %cst_4 : f32 to vector<8x1xf32>
    %10 = arith.mulf %9, %8 : vector<8x1xf32>
    %11 = tpu.iota {dimensions = array<i32: 0>} : vector<8x1xi32>
    %c1_i32 = arith.constant 1 : i32
    %12 = arith.muli %arg0, %c1_i32 : i32
    %13 = arith.addi %12, %arg1 : i32
    %c8_i32 = arith.constant 8 : i32
    %14 = arith.muli %13, %c8_i32 : i32
    %15 = vector.broadcast %14 : i32 to vector<8x1xi32>
    %16 = arith.addi %15, %11 : vector<8x1xi32>
    %c8_i32_5 = arith.constant 8 : i32
    %17 = vector.broadcast %c8_i32_5 : i32 to vector<8x1xi32>
    %18 = arith.cmpi slt, %16, %17 : vector<8x1xi32>
    %cst_6 = arith.constant 0.000000e+00 : f32
    %19 = vector.broadcast %cst_6 : f32 to vector<8x1xf32>
    %20 = arith.select %18, %10, %19 : vector<8x1xi1>, vector<8x1xf32>
    %c0_7 = arith.constant 0 : index
    %c0_8 = arith.constant 0 : index
    %21 = vector.load %arg5[%c0_7, %c0_8] : memref<1x1xf32, #tpu.memory_space<vmem>>, vector<1x1xf32>
    %22 = vector.shape_cast %20 : vector<8x1xf32> to vector<1x8x1xf32>
    %cst_9 = arith.constant dense<0.000000e+00> : vector<1xf32>
    %23 = vector.multi_reduction <add>, %22, %cst_9 [1, 2] : vector<1x8x1xf32> to vector<1xf32>
    %24 = vector.shape_cast %23 : vector<1xf32> to vector<1x1x1xf32>
    %25 = vector.extract %24[0, 0, 0] : f32 from vector<1x1x1xf32>
    %26 = vector.broadcast %25 : f32 to vector<1x1xf32>
    %27 = arith.addf %21, %26 : vector<1x1xf32>
    %c0_10 = arith.constant 0 : index
    %c0_11 = arith.constant 0 : index
    %28 = vector.load %arg5[%c0_10, %c0_11] : memref<1x1xf32, #tpu.memory_space<vmem>>, vector<1x1xf32>
    tpu.vector_store %arg5[%c0_10, %c0_11], %27 {strides = array<i32>} : memref<1x1xf32, #tpu.memory_space<vmem>>, vector<1x1xf32>,
    %c0_i32_12 = arith.constant 0 : i32
    %29 = arith.cmpi eq, %arg1, %c0_i32_12 : i32
    %30 = arith.extui %29 : i1 to i32
    %c0_i32_13 = arith.constant 0 : i32
    %31 = arith.cmpi ne, %30, %c0_i32_13 : i32
    scf.if %31 {
      %c0_14 = arith.constant 0 : index
      %c0_15 = arith.constant 0 : index
      %32 = vector.load %arg5[%c0_14, %c0_15] : memref<1x1xf32, #tpu.memory_space<vmem>>, vector<1x1xf32>
      %c0_16 = arith.constant 0 : index
      %c0_17 = arith.constant 0 : index
      %33 = vector.load %arg4[%c0_16, %c0_17] : memref<1x1xf32, #tpu.memory_space<vmem>>, vector<1x1xf32>
      tpu.vector_store %arg4[%c0_16, %c0_17], %32 {strides = array<i32>} : memref<1x1xf32, #tpu.memory_space<vmem>>, vector<1x1xf32>,
    } else {
    }
    return
  }
  func.func @transform_0(%arg0: i32, %arg1: i32) -> (i32, i32) {
    %c1_i32 = arith.constant 1 : i32
    %0 = arith.muli %arg0, %c1_i32 : i32
    %1 = arith.addi %0, %arg1 : i32
    %c0_i32 = arith.constant 0 : i32
    %c0_i32_0 = arith.constant 0 : i32
    return %1, %c0_i32 : i32, i32
  }
  func.func @transform_1(%arg0: i32, %arg1: i32) -> (i32, i32) {
    %c1_i32 = arith.constant 1 : i32
    %0 = arith.muli %arg0, %c1_i32 : i32
    %1 = arith.addi %0, %arg1 : i32
    %c0_i32 = arith.constant 0 : i32
    %c0_i32_0 = arith.constant 0 : i32
    return %1, %c0_i32 : i32, i32
  }
  func.func @transform_2(%arg0: i32, %arg1: i32) -> (i32, i32) {
    %c0_i32 = arith.constant 0 : i32
    %c0_i32_0 = arith.constant 0 : i32
    return %arg0, %c0_i32 : i32, i32
  }
}

</mosaic_0001>

<bundles_post_ra>
// kernel: tpu_custom_call.1
= control target key start
LH: loop header
LB: loop body
LE: loop exit
PB: predicated region body
PF: predicated region fallthrough
CT: control target
= control target key end

     0   :  { %7 = vsyncpa [#allocation4], 0  ;;  %s205_s0 = inlined_call_operand.hbm [shape: f32[8,128], index: 0, kind: input, shape index: {}]   ;;  %s206_s1 = inlined_call_operand.hbm [shape: f32[8,128], index: 1, kind: input, shape index: {}]   ;;  %s207_s2 = inlined_call_operand.hbm [shape: f32[1,1], index: 2, kind: output, shape index: {}]  }
   0x1   :  { %8 = vsyncpa [#allocation7], 0 }
   0x2   :  { %9 = vsyncpa [#allocation5], 0  ;;  %s174_s9 = smov [#allocation3]   ;;  %s175_s11 = smov [#allocation6]  }
   0x3   :  { %s19_s10 = sshll.u32 %s174_s9, 4  ;;  %s32_s12 = sshll.u32 %s175_s11, 4  ;;  %s20_s10 = int_to_ptr.vmem [resolvable:$true] %s19_s10  ;;  %s33_s12 = int_to_ptr.vmem [resolvable:$true] %s32_s12 }
   0x4   :  { %s116_s13 = scalar_lea.vmem %s20_s10, 128  ;;  %p121_p1 = scmp.lt.s32.totalorder %s20_s10, %s20_s10 }
   0x5   :  { %p117_p0 = scmp.ne.s32.totalorder %s20_s10, %s116_s13  ;;  %p122_p2 = scmp.lt.s32.totalorder %s116_s13, %s116_s13 }
   0x7   :  { %p123_p3 = por %p122_p2, %p121_p1 }
   0x9   :  { %p124_p4 = pnand %p123_p3, %p117_p0 }
   0xb   :  { %127 = shalt.err (!%p124_p4)
}
   0xc   :  { %22 = dma.hbm_to_vmem [thread:$0]  %s205_s0, 128, %s20_s10, [#allocation4]  }
   0xd   :  { %s136_s16 = scalar_lea.vmem %s33_s12, 128  ;;  %p141_p6 = scmp.lt.s32.totalorder %s33_s12, %s33_s12 }
   0xe   :  { %p137_p5 = scmp.ne.s32.totalorder %s33_s12, %s136_s16  ;;  %p142_p7 = scmp.lt.s32.totalorder %s136_s16, %s136_s16 }
  0x10   :  { %p143_p8 = por %p142_p7, %p141_p6 }
  0x12   :  { %p144_p9 = pnand %p143_p8, %p137_p5 }
  0x14   :  { %147 = shalt.err (!%p144_p9)
}
  0x15   :  { %35 = dma.hbm_to_vmem [thread:$0]  %s206_s1, 128, %s33_s12, [#allocation7]  }
  0x16   :  { %168 = dma.done.wait [#allocation4], 128  }
  0x17   :  { %169 = vsyncadd [#allocation4], 4294967168 }
  0x18   :  { %170 = dma.done.wait [#allocation7], 128  }
  0x19   :  { %171 = vsyncadd [#allocation7], 4294967168  ;;  %v50_v0 = vld [vmem:[#allocation3] sm:$0xff]  ;;  %v51_v1 = vld [vmem:[#allocation6] sm:$0xff]  ;;  %vm66_vm0 = vcmask 7168   ;;  %vm48_vm1 = vcmask 0  }
  0x1a   :  { %v52_v2 = vsub.f32 %v51_v1, %v50_v0  ;;  %v176_v7 = vmov 0.0   ;;  %s177_s1 = smov [#allocation8]  }
  0x1b   :  { %49 = vst.msk [vmem:[#allocation2] sm:$0x1] %vm48_vm1, %v176_v7  ;;  %s92_s19 = sshll.u32 %s177_s1, 4  ;;  %s93_s19 = int_to_ptr.vmem [resolvable:$true] %s92_s19 }
  0x1c   :  { %v53_v3 = vmul.f32 %v52_v2, %v52_v2  ;;  %s148_s20 = scalar_lea.vmem %s93_s19, 16  ;;  %s152_s21 = scalar_lea.vmem %s93_s19, 32 }
  0x1d   :  { %p149_p10 = scmp.ne.s32.totalorder %s93_s19, %s148_s20  ;;  %p153_p11 = scmp.lt.s32.totalorder %s93_s19, %s93_s19 }
  0x1e   :  { %54 = vadd.xlane.f32.xlu0 %v53_v3  ;;  %p154_p12 = scmp.lt.s32.totalorder %s152_s21, %s148_s20 }
  0x20   :  { %p155_p13 = por %p154_p12, %p153_p11 }
  0x22   :  { %v65_v15 = vld [vmem:[#allocation2] sm:$0x1]  ;;  %p156_p0 = pnand %p155_p13, %p149_p10 }
  0xa7   :  { %v55_v4 = vpop.xlane.xlu0 %54 }
  0xa8   :  { %v56_v5 = vmul.f32 0.5, %v55_v4 }
  0xaa   :  { %v67_v6 = vsel %vm66_vm0, %v56_v5, 0.0 }
  0xab   :  { %68 = vadd.xlane.f32.xlu0 %v67_v6 }
 0x134   :  { %v69_v8 = vpop.xlane.xlu0 %68 }
 0x135   :  { %v70_v9 = vrot.slane %v69_v8, 4 }
 0x137   :  { %v71_v10 = vadd.f32 %v70_v9, %v69_v8 }
 0x139   :  { %v72_v11 = vrot.slane %v71_v10, 2 }
 0x13b   :  { %v73_v12 = vadd.f32 %v72_v11, %v71_v10 }
 0x13d   :  { %v74_v13 = vrot.slane %v73_v12, 1 }
 0x13f   :  { %v75_v14 = vadd.f32 %v74_v13, %v73_v12 }
 0x141   :  { %102 = vpush %v75_v14 }
 0x172   :  { %s103_s0 = spop %102 }
 0x173   :  { %v77_v16 = vstv %s103_s0 }
 0x174   :  { %v78_v17 = vadd.f32 %v77_v16, %v65_v15 }
 0x176   :  { %80 = vst.msk [vmem:[#allocation2] sm:$0x1] %vm48_vm1, %v78_v17 }
 0x17d   :  { %v84_v18 = vld [vmem:[#allocation2] sm:$0x1] }
 0x17e   :  { %85 = vst.msk [vmem:[#allocation8] sm:$0x1] %vm48_vm1, %v84_v18 }
 0x17f   :  { %159 = shalt.err (!%p156_p0)
}
 0x180   :  { %95 = dma.vmem_to_hbm [thread:$0]  %s93_s19, 16, %s207_s2, [#allocation5]  }
 0x181   :  { %172 = dma.done.wait [#allocation5], 16  }
 0x182   :  { %173 = vsyncadd [#allocation5], 4294967280 }
 0x183   :  { %99 = vsyncpa [#allocation4], 1 }
 0x184   :  { %100 = vsyncpa [#allocation7], 1 }
 0x185   :  { %101 = vsyncpa [#allocation5], 1 }

</bundles_post_ra>
